<compile_context>
chip_gen: v5e
topology: v5e:2x2
jax: 0.10.0
libtpu: 0.0.40
codegen_flags: <defaults>
</compile_context>

<pallas_src>
import functools

import jax
import jax.numpy as jnp
from jax.experimental import pallas as pl
from jax.experimental.pallas import tpu as pltpu


def _round_up(x, m):
    return ((x + m - 1) // m) * m


def _cdiv(a, b):
    return (a + b - 1) // b


def _self_attention_kernel(x_ref, w_ref, b_ref, weighted_ref, attn_ref, *,
                           input_dim, d_pad):
    x = x_ref[...]                                            # (tm, Dp)

    # Fused Q/K/V projection: one (tm, Dp) @ (Dp, 3*Dp) MXU matmul.
    qkv = jnp.dot(x, w_ref[...], preferred_element_type=jnp.float32) + b_ref[...]
    q = qkv[:, 0 * d_pad:1 * d_pad]
    k = qkv[:, 1 * d_pad:2 * d_pad]
    v = qkv[:, 2 * d_pad:3 * d_pad]

    # Elementwise "scores" + softmax over the feature axis (torch dim=2).
    scores = (q * k) * (1.0 / (float(input_dim) ** 0.5))
    if d_pad != input_dim:
        # Padded lanes must not participate in the softmax.
        lane = jax.lax.broadcasted_iota(jnp.int32, scores.shape, 1)
        scores = jnp.where(lane < input_dim, scores, -jnp.inf)

    m = jnp.max(scores, axis=-1, keepdims=True)
    e = jnp.exp(scores - m)
    denom = jnp.sum(e, axis=-1, keepdims=True)
    attn = e * pl.reciprocal(denom, approx=True)              # EUP vrcp slot

    weighted_ref[...] = (attn * v).astype(weighted_ref.dtype)
    attn_ref[...] = attn.astype(attn_ref.dtype)


def self_attention(x, wq, bq, wk, bk, wv, bv, *, tm=512):
    """x: (B, S, D) f32.  w*: (D, D) PyTorch-layout (out, in).  b*: (D,)."""
    B, S, D = x.shape
    M = B * S
    Dp = _round_up(D, 128)                   # lane-dense feature dim

    # Row tile: as big as requested, multiple of 8, and keep >= 2 grid steps
    # when M allows so v7x can shard the parallel axis across both TCs.
    tm = max(8, min(tm, _round_up(M, 8)))
    if _cdiv(M, tm) < 2 and M > 8:
        tm = _round_up(_cdiv(M, 2), 8)
    Mp = _round_up(M, tm)
    grid_m = Mp // tm

    # Flatten rows, pad rows to Mp and lanes to Dp (zero padding is harmless:
    # padded lanes are masked out of the softmax, padded rows are sliced off).
    x2 = jnp.pad(x.reshape(M, D).astype(jnp.float32),
                 ((0, Mp - M), (0, Dp - D)))

    def pad_w(w):  # torch (out, in) -> transposed + zero-padded (Dp, Dp)
        return jnp.pad(w.T.astype(jnp.float32), ((0, Dp - D), (0, Dp - D)))

    def pad_b(b):
        return jnp.pad(b.astype(jnp.float32), (0, Dp - D))

    w_fused = jnp.concatenate([pad_w(wq), pad_w(wk), pad_w(wv)], axis=1)   # (Dp, 3Dp)
    b_fused = jnp.concatenate([pad_b(bq), pad_b(bk), pad_b(bv)]).reshape(1, 3 * Dp)

    row_spec = pl.BlockSpec((tm, Dp), lambda i: (i, 0))
    w_spec = pl.BlockSpec((Dp, 3 * Dp), lambda i: (0, 0))
    b_spec = pl.BlockSpec((1, 3 * Dp), lambda i: (0, 0))

    # VMEM budget: double-buffered x tile + two outputs, resident fused
    # weights, plus the (tm, 3Dp) intermediate.  Cap at 50 MiB (fits v7x).
    est_bytes = 4 * (2 * tm * Dp              # x tile (double-buffered)
                     + 2 * 2 * tm * Dp        # weighted + attn (double-buffered)
                     + 2 * Dp * 3 * Dp        # fused weight (+ headroom)
                     + 2 * tm * 3 * Dp)       # qkv intermediate / slack
    vmem_limit = int(min(max(2 * est_bytes, 16 * 1024 * 1024), 50 * 1024 * 1024))

    weighted, attn = pl.pallas_call(
        functools.partial(_self_attention_kernel, input_dim=D, d_pad=Dp),
        out_shape=(jax.ShapeDtypeStruct((Mp, Dp), jnp.float32),
                   jax.ShapeDtypeStruct((Mp, Dp), jnp.float32)),
        grid_spec=pltpu.PrefetchScalarGridSpec(
            num_scalar_prefetch=0,
            grid=(grid_m,),
            in_specs=[row_spec, w_spec, b_spec],
            out_specs=[row_spec, row_spec],
        ),
        compiler_params=pltpu.CompilerParams(
            dimension_semantics=("parallel",),
            vmem_limit_bytes=vmem_limit),
    )(x2, w_fused, b_fused)

    weighted = weighted[:M, :D].reshape(B, S, D).astype(x.dtype)
    attn = attn[:M, :D].reshape(B, S, D).astype(x.dtype)
    return weighted, attn


def _reference(x, wq, bq, wk, bk, wv, bv):
    q = jnp.einsum("bsd,ed->bse", x, wq) + bq
    k = jnp.einsum("bsd,ed->bse", x, wk) + bk
    v = jnp.einsum("bsd,ed->bse", x, wv) + bv
    scores = (q * k) / (x.shape[-1] ** 0.5)
    attn = jax.nn.softmax(scores, axis=2)
    return attn * v, attn


if __name__ == "__main__":
    key = jax.random.PRNGKey(0)
    B, S, D = 2, 8, 32  # batch, seq, input_dim

    kx, kq, kbq, kk, kbk, kv, kbv = jax.random.split(key, 7)
    bound = 1.0 / (D ** 0.5)  # mimic nn.Linear default init range
    x = jax.random.normal(kx, (B, S, D), dtype=jnp.float32)
    wq = jax.random.uniform(kq, (D, D), minval=-bound, maxval=bound, dtype=jnp.float32)
    bq = jax.random.uniform(kbq, (D,), minval=-bound, maxval=bound, dtype=jnp.float32)
    wk = jax.random.uniform(kk, (D, D), minval=-bound, maxval=bound, dtype=jnp.float32)
    bk = jax.random.uniform(kbk, (D,), minval=-bound, maxval=bound, dtype=jnp.float32)
    wv = jax.random.uniform(kv, (D, D), minval=-bound, maxval=bound, dtype=jnp.float32)
    bv = jax.random.uniform(kbv, (D,), minval=-bound, maxval=bound, dtype=jnp.float32)

    weighted, attn = self_attention(x, wq, bq, wk, bk, wv, bv)
    jax.block_until_ready((weighted, attn))

    ref_w, ref_a = _reference(x, wq, bq, wk, bk, wv, bv)
    # approx=True reciprocal trades a few ULPs for the free EUP slot, so the
    # comparison tolerance is relaxed slightly vs. exact-f32.
    assert jnp.allclose(weighted, ref_w, atol=1e-3, rtol=1e-3), float(
        jnp.max(jnp.abs(weighted - ref_w)))
    assert jnp.allclose(attn, ref_a, atol=1e-3, rtol=1e-3), float(
        jnp.max(jnp.abs(attn - ref_a)))

    print("KERNEL_OK")
</pallas_src>

<mosaic_0001>
module attributes {stable_mosaic.version = 11 : i64} {
  func.func @_self_attention_kernel(%arg0: i32, %arg1: memref<8x128xf32, #tpu.memory_space<vmem>>, %arg2: memref<128x384xf32, #tpu.memory_space<vmem>>, %arg3: memref<1x384xf32, #tpu.memory_space<vmem>>, %arg4: memref<8x128xf32, #tpu.memory_space<vmem>>, %arg5: memref<8x128xf32, #tpu.memory_space<vmem>>) attributes {dimension_semantics = [#tpu.dimension_semantics<parallel>], iteration_bounds = array<i64: 2>, scalar_prefetch = 0 : i64, scratch_operands = 0 : i64, tpu.core_type = #tpu.core_type<tc>, window_params = [{transform_indices = @transform_0, window_bounds = array<i64: 8, 128>}, {pipeline_mode = #tpu.pipeline_mode<synchronous>, transform_indices = @transform_1, window_bounds = array<i64: 128, 384>}, {pipeline_mode = #tpu.pipeline_mode<synchronous>, transform_indices = @transform_2, window_bounds = array<i64: 1, 384>}, {transform_indices = @transform_3, window_bounds = array<i64: 8, 128>}, {transform_indices = @transform_4, window_bounds = array<i64: 8, 128>}]} {
    %c0 = arith.constant 0 : index
    %c0_0 = arith.constant 0 : index
    %0 = vector.load %arg1[%c0, %c0_0] : memref<8x128xf32, #tpu.memory_space<vmem>>, vector<8x128xf32>
    %c0_1 = arith.constant 0 : index
    %c0_2 = arith.constant 0 : index
    %1 = vector.load %arg2[%c0_1, %c0_2] : memref<128x384xf32, #tpu.memory_space<vmem>>, vector<128x384xf32>
    %cst = arith.constant dense<0.000000e+00> : vector<8x384xf32>
    %2 = tpu.matmul %0, %1, %cst {dimension_numbers = #tpu.dot_dimension_numbers<[1], [0], [0], [1], [0, 0, 1, 1], [], []>} : vector<8x128xf32>, vector<128x384xf32>, vector<8x384xf32> -> vector<8x384xf32>
    %c0_3 = arith.constant 0 : index
    %c0_4 = arith.constant 0 : index
    %3 = vector.load %arg3[%c0_3, %c0_4] : memref<1x384xf32, #tpu.memory_space<vmem>>, vector<1x384xf32>
    %4 = vector.broadcast %3 : vector<1x384xf32> to vector<8x384xf32>
    %5 = arith.addf %2, %4 : vector<8x384xf32>
    %6 = vector.extract_strided_slice %5 {offsets = [0, 0], sizes = [8, 128], strides = [1, 1]} : vector<8x384xf32> to vector<8x128xf32>
    %7 = vector.extract_strided_slice %5 {offsets = [0, 128], sizes = [8, 128], strides = [1, 1]} : vector<8x384xf32> to vector<8x128xf32>
    %8 = vector.extract_strided_slice %5 {offsets = [0, 256], sizes = [8, 128], strides = [1, 1]} : vector<8x384xf32> to vector<8x128xf32>
    %9 = arith.mulf %6, %7 : vector<8x128xf32>
    %cst_5 = arith.constant 0.176776692 : f32
    %10 = vector.broadcast %cst_5 : f32 to vector<8x128xf32>
    %11 = arith.mulf %9, %10 : vector<8x128xf32>
    %12 = tpu.iota {dimensions = array<i32: 1>} : vector<8x128xi32>
    %c32_i32 = arith.constant 32 : i32
    %13 = vector.broadcast %c32_i32 : i32 to vector<8x128xi32>
    %14 = arith.cmpi slt, %12, %13 : vector<8x128xi32>
    %cst_6 = arith.constant 0xFF800000 : f32
    %15 = vector.broadcast %cst_6 : f32 to vector<8x128xf32>
    %16 = arith.select %14, %11, %15 : vector<8x128xi1>, vector<8x128xf32>
    %cst_7 = arith.constant dense<0xFF800000> : vector<8xf32>
    %17 = vector.multi_reduction <maximumf>, %16, %cst_7 [1] : vector<8x128xf32> to vector<8xf32>
    %18 = vector.shape_cast %17 : vector<8xf32> to vector<8x1xf32>
    %19 = vector.broadcast %18 : vector<8x1xf32> to vector<8x128xf32>
    %20 = arith.subf %16, %19 : vector<8x128xf32>
    %21 = math.exp %20 : vector<8x128xf32>
    %cst_8 = arith.constant dense<0.000000e+00> : vector<8xf32>
    %22 = vector.multi_reduction <add>, %21, %cst_8 [1] : vector<8x128xf32> to vector<8xf32>
    %23 = vector.shape_cast %22 : vector<8xf32> to vector<8x1xf32>
    %24 = tpu.reciprocal %23 {approx = true} : vector<8x1xf32> -> vector<8x1xf32>
    %25 = vector.broadcast %24 : vector<8x1xf32> to vector<8x128xf32>
    %26 = arith.mulf %21, %25 : vector<8x128xf32>
    %27 = arith.mulf %26, %8 : vector<8x128xf32>
    %c0_9 = arith.constant 0 : index
    %c0_10 = arith.constant 0 : index
    %28 = vector.load %arg4[%c0_9, %c0_10] : memref<8x128xf32, #tpu.memory_space<vmem>>, vector<8x128xf32>
    tpu.vector_store %arg4[%c0_9, %c0_10], %27 {strides = array<i32>} : memref<8x128xf32, #tpu.memory_space<vmem>>, vector<8x128xf32>,
    %c0_11 = arith.constant 0 : index
    %c0_12 = arith.constant 0 : index
    %29 = vector.load %arg5[%c0_11, %c0_12] : memref<8x128xf32, #tpu.memory_space<vmem>>, vector<8x128xf32>
    tpu.vector_store %arg5[%c0_11, %c0_12], %26 {strides = array<i32>} : memref<8x128xf32, #tpu.memory_space<vmem>>, vector<8x128xf32>,
    return
  }
  func.func @transform_0(%arg0: i32) -> (i32, i32) {
    %c0_i32 = arith.constant 0 : i32
    %c0_i32_0 = arith.constant 0 : i32
    return %arg0, %c0_i32 : i32, i32
  }
  func.func @transform_1(%arg0: i32) -> (i32, i32) {
    %c0_i32 = arith.constant 0 : i32
    %c0_i32_0 = arith.constant 0 : i32
    %c0_i32_1 = arith.constant 0 : i32
    return %c0_i32, %c0_i32_0 : i32, i32
  }
  func.func @transform_2(%arg0: i32) -> (i32, i32) {
    %c0_i32 = arith.constant 0 : i32
    %c0_i32_0 = arith.constant 0 : i32
    %c0_i32_1 = arith.constant 0 : i32
    return %c0_i32, %c0_i32_0 : i32, i32
  }
  func.func @transform_3(%arg0: i32) -> (i32, i32) {
    %c0_i32 = arith.constant 0 : i32
    %c0_i32_0 = arith.constant 0 : i32
    return %arg0, %c0_i32 : i32, i32
  }
  func.func @transform_4(%arg0: i32) -> (i32, i32) {
    %c0_i32 = arith.constant 0 : i32
    %c0_i32_0 = arith.constant 0 : i32
    return %arg0, %c0_i32 : i32, i32
  }
}

</mosaic_0001>

<bundles_post_ra>
// kernel: tpu_custom_call.1
= control target key start
LH: loop header
LB: loop body
LE: loop exit
PB: predicated region body
PF: predicated region fallthrough
CT: control target
= control target key end

     0   :  { %10 = vsyncpa [#allocation3], 0  ;;  %s1047_s0 = inlined_call_operand.hbm [shape: f32[16,128], index: 0, kind: input, shape index: {}]   ;;  %s1048_s1 = inlined_call_operand.hbm [shape: f32[128,384], index: 1, kind: input, shape index: {}]   ;;  %s1049_s2 = inlined_call_operand.hbm [shape: f32[1,384], index: 2, kind: input, shape index: {}]   ;;  %s1050_s3 = inlined_call_operand.hbm [shape: f32[16,128], index: 3, kind: output, shape index: {0}]   ;;  %s1051_s4 = inlined_call_operand.hbm [shape: f32[16,128], index: 4, kind: output, shape index: {1}]  }
   0x1   :  { %12 = vsyncpa [#allocation3 + $0x1], 0 }
   0x2   :  { %13 = vsyncpa [#allocation6], 0 }
   0x3   :  { %14 = vsyncpa [#allocation4], 0 }
   0x4   :  { %16 = vsyncpa [#allocation4 + $0x1], 0 }
   0x5   :  { %17 = vsyncpa [#allocation10], 0 }
   0x6   :  { %19 = vsyncpa [#allocation10 + $0x1], 0  ;;  %s869_s15 = smov 0   ;;  %s871_s16 = smov 0  }
   0x7   :  { %s873_s17 = smov 0   ;;  %s875_s18 = smov 0  }
   0x8 LB: > { %s161_s21 = sshll.u32 %s1048_s1, 4  ;;  %s893_s22 = sadd.s32 4294967295, %s838_s18   ;;  %s838_s18 = sphi %s875_s18, %s1062_s18   ;;  %s834_s17 = sphi %s873_s17, %s1061_s17   ;;  %s830_s16 = sphi %s871_s16, %s1060_s16   ;;  %s826_s15 = sphi %s869_s15, %s1059_s15   ;;  %s162_s21 = int_to_ptr.hbm [resolvable:$true] %s161_s21 }
   0x9   : > { %p550_p0 = scmp.ge.s32.totalorder %s838_s18, 1  ;;  %p46_p1 = scmp.eq.s32.totalorder %s893_s22, 0 }
   0xa   : > { %p150_p2 = scmp.lt.s32.totalorder %s838_s18, 3  ;;  %s840_s24 = smov [#allocation5]  }
   0xb   : > { %s163_s25 = sshll.u32 %s840_s24, 4  ;;  %s176_s28 = sshll.u32 %s1049_s2, 4  ;;  %s164_s25 = int_to_ptr.vmem [resolvable:$true] %s163_s25  ;;  %s177_s28 = int_to_ptr.hbm [resolvable:$true] %s176_s28 }
   0xc   : > { %p898_p3 = pnand %p550_p0, %p150_p2  ;;  %s841_s29 = smov [#allocation7]  }
   0xd   : > { %s178_s30 = sshll.u32 %s841_s29, 4  ;;  %s842_s5 = smov 384   ;;  %s179_s30 = int_to_ptr.vmem [resolvable:$true] %s178_s30 }
   0xe   : > { %p582_p4 = pneg %p898_p3  ;;  %s843_s6 = smov 24  }
   0xf   : > { %s549_s7 = sadd.s32 4294967294, %s838_s18   ;;  %s912_s8 = sadd.s32 1, %s838_s18  }
  0x10   : > { %p583_p6 = pnand %p582_p4, %p46_p1  ;;  %s29_s9 = ssub.s32 %s838_s18, %s912_s8 }
  0x11   : > { %s32_s10 = sadd.s32 1, %s834_s17  ;;  %p30_p7 = scmp.eq.s32.totalorder %s29_s9, 0 }
  0x12   : > { %585 = dma.hbm_to_vmem [thread:$0]  (!%p583_p6), %s162_s21, 6144, %s164_s25, [#allocation6], %s842_s5, %s842_s5, %s843_s6  }
  0x13   : > { %588 = dma.hbm_to_vmem [thread:$0]  (!%p583_p6), %s177_s28, 48, %s179_s30, [#allocation6]  }
  0x14   : > { %p39_p8 = scmp.ne.s32.totalorder %s834_s17, %s830_s16  ;;  %p40_p9 = scmp.eq.s32.totalorder %s838_s18, 0 }
  0x15   : > { %p45_p10 = scmp.ne.s32.totalorder %s830_s16, %s826_s15  ;;  %p111_p13 = scmp.eq.s32.totalorder %s893_s22, 1 }
  0x16   : > { %s923_s11 = scalar_select %p30_p7, %s834_s17, %s32_s10  }
  0x17   : > { %p925_p11 = por %p40_p9, %p39_p8  ;;  %p931_p12 = por %p46_p1, %p45_p10 }
  0x18   : > { %p117_p0 = scmp.eq.s32.totalorder %s549_s7, 1  ;;  %p602_p2 = scmp.lt.s32.totalorder %s838_s18, 2 }
  0x19   : > { %s189_s14 = sand.u32 1, %s834_s17   ;;  %p938_p4 = por %p111_p13, %p39_p8 }
  0x1a   : > { %p942_p6 = por %p117_p0, %p45_p10  ;;  %s554_s21 = sshll.u32 %s189_s14, 3 }
  0x1b   : > { %s555_s24 = sshll.u32 %s838_s18, 3  ;;  %s193_s28 = scalar_lea.vmem [#allocation2], %s554_s21 }
  0x1c   : > { %s197_s27 = scalar_lea.hbm %s1047_s0, %s555_s24  ;;  %s201_s29 = sshll.u32 %s193_s28, 4  ;;  %s202_s29 = int_to_ptr.vmem [resolvable:$true] %s201_s29 }
  0x1d   : > { %s199_s30 = sshll.u32 %s197_s27, 4  ;;  %p952_p7 = pnand %p602_p2, %p925_p11  ;;  %s200_s30 = int_to_ptr.hbm [resolvable:$true] %s199_s30 }
  0x1e   : > { %s190_s6 = scalar_lea.sflag [#allocation3], %s189_s14  ;;  %s706_s7 = sshra.s32 %s200_s30, 4  ;;  %s707_s7 = int_to_ptr.hbm [resolvable:$true] %s706_s7 }
  0x1f   : > { %s708_s9 = scalar_lea.hbm %s707_s7, 8  ;;  %p710_p9 = pneg %p952_p7 }
  0x20   : > { %p709_p8 = scmp.ne.s32.totalorder %s707_s7, %s708_s9  ;;  %s713_s24 = scalar_lea.hbm %s1047_s0, 16 }
  0x21   : > { %p714_p11 = scmp.lt.s32.totalorder %s707_s7, %s1047_s0  ;;  %p715_p0 = scmp.lt.s32.totalorder %s713_s24, %s708_s9 }
  0x22   : > { %p711_p10 = pnand %p710_p9, %p709_p8 }
  0x23   : > { %p716_p2 = por %p715_p0, %p714_p11 }
  0x24   : > { %p712_p13 = pneg %p711_p10 }
  0x26   : > { %p717_p5 = pnand %p716_p2, %p712_p13 }
  0x28   : > { %720 = shalt.err (!%p717_p5)
}
  0x29   : > { %592 = dma.hbm_to_vmem [thread:$0]  (!%p952_p7), %s200_s30, 128, %s202_s29, %s190_s6  }
  0x2a   : > { %210 = sbr.rel (%p898_p3) target bundleno = 482 (0x1e2), region = 32  ;;  %s969_s14 = sand.u32 (!%p898_p3), 1, %s830_s16  }
  0x2b   : > { %s972_s26 = sshll.u32 (!%p898_p3), %s969_s14, 3  ;;  %s213_s27 = scalar_lea.sflag (!%p898_p3), [#allocation3], %s969_s14 }
  0x2c   : > { %s216_s28 = scalar_lea.vmem (!%p898_p3), [#allocation2], %s972_s26 }
  0x2f   : > { %809 = dma.done.wait (%p931_p12), %s213_s27, 128  }
  0x30   : > { %811 = vsyncadd (%p931_p12), %s213_s27, 4294967168 }
  0x31   : > { %813 = dma.done.wait (%p46_p1), [#allocation6], 6192  }
  0x32   : > { %815 = vsyncadd (%p46_p1), [#allocation6], 4294961104  ;;  %v303_v0 = vld [vmem:[#allocation5 + $0x168] sm:$0xff]  ;;  %v304_v1 = vld [vmem:[#allocation5 + $0x170] sm:$0xff]  ;;  %v376_v45 = vlaneseq  ;;  %s564_s23 = sshll.u32 %s893_s22, 3  ;;  %s256_s9 = scalar_lea.vmem [#allocation9], %s972_s26 }
  0x33   : > { %v300_v2 = vld [vmem:[#allocation5 + $0x150] sm:$0xff]  ;;  %314 = vmatpush.msra.mxu0 %v303_v0  ;;  %334 = vmatpush.msra.mxu1 %v304_v1  ;;  %v301_v3 = vld [vmem:[#allocation5 + $0x158] sm:$0xff]  ;;  %v298_v5 = vld [vmem:[#allocation5 + $0x140] sm:$0xff]  ;;  %s422_s30 = scalar_lea.hbm %s1051_s4, %s564_s23  ;;  %s408_s7 = scalar_lea.hbm %s1050_s3, %s564_s23 }
  0x34   : > { %v297_v4 = vld [vmem:[#allocation5 + $0x138] sm:$0xff]  ;;  %v294_v6 = vld [vmem:[#allocation5 + $0x120] sm:$0xff]  ;;  %v295_v7 = vld [vmem:[#allocation5 + $0x128] sm:$0xff]  ;;  %v377_v52 = vand.u32 127, %v376_v45  ;;  %s994_s10 = sshll.u32 %s256_s9, 4  ;;  %s426_s21 = sshll.u32 %s422_s30, 4  ;;  %s425_s10 = int_to_ptr.vmem [resolvable:$true] %s994_s10  ;;  %s427_s21 = int_to_ptr.hbm [resolvable:$true] %s426_s21 }
  0x35   : > { %315 = vmatpush.msra.mxu0 %v300_v2  ;;  %335 = vmatpush.msra.mxu1 %v301_v3  ;;  %v291_v8 = vld [vmem:[#allocation5 + $0x108] sm:$0xff]  ;;  %v292_v9 = vld [vmem:[#allocation5 + $0x110] sm:$0xff]  ;;  %v289_v11 = vld [vmem:[#allocation5 + $0xf8] sm:$0xff]  ;;  %s249_s22 = scalar_lea.vmem [#allocation8], %s972_s26  ;;  %s412_s25 = sshll.u32 %s408_s7, 4  ;;  %s1001_s25 = int_to_ptr.hbm [resolvable:$true] %s412_s25 }
  0x36   : > { %v288_v10 = vld [vmem:[#allocation5 + $0xf0] sm:$0xff]  ;;  %v285_v12 = vld [vmem:[#allocation5 + $0xd8] sm:$0xff]  ;;  %v286_v13 = vld [vmem:[#allocation5 + $0xe0] sm:$0xff]  ;;  %vm378_vm0 = vcmp.lt.s32.totalorder %v377_v52, 32  ;;  %s997_s24 = sshll.u32 %s249_s22, 4  ;;  %s398_s12 = scalar_lea.sflag [#allocation10], %s969_s14  ;;  %s411_s24 = int_to_ptr.vmem [resolvable:$true] %s997_s24 }
  0x37   : > { %316 = vmatpush.msra.mxu0 %v297_v4  ;;  %336 = vmatpush.msra.mxu1 %v298_v5  ;;  %v282_v14 = vld [vmem:[#allocation5 + $0xc0] sm:$0xff]  ;;  %v283_v15 = vld [vmem:[#allocation5 + $0xc8] sm:$0xff]  ;;  %v280_v17 = vld [vmem:[#allocation5 + $0xb0] sm:$0xff]  ;;  %s750_s27 = sshra.s32 %s427_s21, 4  ;;  %s756_s13 = scalar_lea.hbm %s1051_s4, 16  ;;  %s751_s27 = int_to_ptr.hbm [resolvable:$true] %s750_s27 }
  0x38   : > { %v279_v16 = vld [vmem:[#allocation5 + $0xa8] sm:$0xff]  ;;  %v276_v18 = vld [vmem:[#allocation5 + $0x90] sm:$0xff]  ;;  %v277_v19 = vld [vmem:[#allocation5 + $0x98] sm:$0xff]  ;;  %p757_p12 = scmp.lt.s32.totalorder %s751_s27, %s1051_s4 }
  0x39   : > { %317 = vmatpush.msra.mxu0 %v294_v6  ;;  %337 = vmatpush.msra.mxu1 %v295_v7  ;;  %v273_v20 = vld [vmem:[#allocation5 + $0x78] sm:$0xff]  ;;  %v274_v21 = vld [vmem:[#allocation5 + $0x80] sm:$0xff]  ;;  %v271_v23 = vld [vmem:[#allocation5 + $0x68] sm:$0xff] }
  0x3a   : > { %v270_v22 = vld [vmem:[#allocation5 + $0x60] sm:$0xff]  ;;  %v267_v24 = vld [vmem:[#allocation5 + $0x48] sm:$0xff]  ;;  %v268_v25 = vld [vmem:[#allocation5 + $0x50] sm:$0xff] }
  0x3b   : > { %318 = vmatpush.msra.mxu0 %v291_v8  ;;  %338 = vmatpush.msra.mxu1 %v292_v9  ;;  %v264_v26 = vld [vmem:[#allocation5 + $0x30] sm:$0xff]  ;;  %v265_v27 = vld [vmem:[#allocation5 + $0x38] sm:$0xff]  ;;  %v262_v29 = vld [vmem:[#allocation5 + $0x20] sm:$0xff] }
  0x3c   : > { %v261_v28 = vld [vmem:[#allocation5 + $0x18] sm:$0xff]  ;;  %v258_v30 = vld [vmem:[#allocation5] sm:$0xff]  ;;  %v259_v31 = vld [vmem:[#allocation5 + $0x8] sm:$0xff] }
  0x3d   : > { %319 = vmatpush.msra.mxu0 %v288_v10  ;;  %339 = vmatpush.msra.mxu1 %v289_v11  ;;  %v257_v32 = vld [vmem:[%s216_s28] sm:$0xff]  ;;  %v302_v34 = vld [vmem:[#allocation5 + $0x160] sm:$0xff]  ;;  %v299_v35 = vld [vmem:[#allocation5 + $0x148] sm:$0xff]  ;;  %s752_s28 = scalar_lea.hbm %s751_s27, 8 }
  0x3e   : > { %v305_v33 = vld [vmem:[#allocation5 + $0x178] sm:$0xff]  ;;  %v296_v36 = vld [vmem:[#allocation5 + $0x130] sm:$0xff]  ;;  %v290_v38 = vld [vmem:[#allocation5 + $0x100] sm:$0xff]  ;;  %p753_p1 = scmp.ne.s32.totalorder %s751_s27, %s752_s28  ;;  %p758_p7 = scmp.lt.s32.totalorder %s756_s13, %s752_s28 }
  0x3f   : > { %320 = vmatpush.msra.mxu0 %v285_v12  ;;  %340 = vmatpush.msra.mxu1 %v286_v13  ;;  %v293_v37 = vld [vmem:[#allocation5 + $0x118] sm:$0xff]  ;;  %v287_v39 = vld [vmem:[#allocation5 + $0xe8] sm:$0xff]  ;;  %v284_v40 = vld [vmem:[#allocation5 + $0xd0] sm:$0xff] }
  0x40   : > { %354 = vmatpush.msra.mxu2 %v305_v33  ;;  %v281_v41 = vld [vmem:[#allocation5 + $0xb8] sm:$0xff]  ;;  %v278_v42 = vld [vmem:[#allocation5 + $0xa0] sm:$0xff]  ;;  %v275_v44 = vld [vmem:[#allocation5 + $0x88] sm:$0xff]  ;;  %p754_p3 = pnand %p753_p1, %p938_p4  ;;  %p759_p8 = por %p758_p7, %p757_p12 }
  0x41   : > { %321 = vmatpush.msra.mxu0 %v282_v14  ;;  %341 = vmatpush.msra.mxu1 %v283_v15  ;;  %v306_v43 = vld [vmem:[#allocation7] sm:$0x7]  ;;  %v272_v46 = vld [vmem:[#allocation5 + $0x70] sm:$0xff]  ;;  %v269_v49 = vld [vmem:[#allocation5 + $0x58] sm:$0xff] }
  0x42   : > { %355 = vmatpush.msra.mxu2 %v302_v34  ;;  %v308_v47 = vperm.slane %v306_v43, 0  ;;  %v309_v48 = vperm.slane %v306_v43, 1  ;;  %v266_v53 = vld [vmem:[#allocation5 + $0x40] sm:$0xff]  ;;  %v263_v56 = vld [vmem:[#allocation5 + $0x28] sm:$0xff]  ;;  %v260_v60 = vld [vmem:[#allocation5 + $0x10] sm:$0xff]  ;;  %v310_v2 = vperm.slane %v306_v43, 2  ;;  %p755_p5 = pneg %p754_p3 }
  0x43   : > { %322 = vmatpush.msra.mxu0 %v279_v16  ;;  %342 = vmatpush.msra.mxu1 %v280_v17 }
  0x44   : > { %356 = vmatpush.msra.mxu2 %v299_v35  ;;  %p760_p9 = pnand %p759_p8, %p755_p5 }
  0x45   : > { %323 = vmatpush.msra.mxu0 %v276_v18  ;;  %343 = vmatpush.msra.mxu1 %v277_v19 }
  0x46   : > { %357 = vmatpush.msra.mxu2 %v296_v36 }
  0x47   : > { %324 = vmatpush.msra.mxu0 %v273_v20  ;;  %344 = vmatpush.msra.mxu1 %v274_v21 }
  0x48   : > { %358 = vmatpush.msra.mxu2 %v293_v37 }
  0x49   : > { %325 = vmatpush.msra.mxu0 %v270_v22  ;;  %345 = vmatpush.msra.mxu1 %v271_v23 }
  0x4a   : > { %359 = vmatpush.msra.mxu2 %v290_v38 }
  0x4b   : > { %326 = vmatpush.msra.mxu0 %v267_v24  ;;  %346 = vmatpush.msra.mxu1 %v268_v25 }
  0x4c   : > { %360 = vmatpush.msra.mxu2 %v287_v39 }
  0x4d   : > { %327 = vmatpush.msra.mxu0 %v264_v26  ;;  %347 = vmatpush.msra.mxu1 %v265_v27 }
  0x4e   : > { %361 = vmatpush.msra.mxu2 %v284_v40 }
  0x4f   : > { %328 = vmatpush.msra.mxu0 %v261_v28  ;;  %348 = vmatpush.msra.mxu1 %v262_v29 }
  0x50   : > { %362 = vmatpush.msra.mxu2 %v281_v41 }
  0x51   : > { %329 = vmatpush.msra.mxu0 %v258_v30  ;;  %349 = vmatpush.msra.mxu1 %v259_v31 }
  0x52   : > { %330 = vmatmul.f32.vlgmr.msra.gmra.mxu0 %v257_v32  ;;  %350 = vmatmul.f32.vlgmr.msra.gmra.mxu1 %v257_v32 }
  0x53   : > { %363 = vmatpush.msra.mxu2 %v278_v42 }
  0x55   : > { %364 = vmatpush.msra.mxu2 %v275_v44 }
  0x57   : > { %365 = vmatpush.msra.mxu2 %v272_v46 }
  0x59   : > { %366 = vmatpush.msra.mxu2 %v269_v49 }
  0x5b   : > { %367 = vmatpush.msra.mxu2 %v266_v53 }
  0x5d   : > { %368 = vmatpush.msra.mxu2 %v263_v56 }
  0x5f   : > { %369 = vmatpush.msra.mxu2 %v260_v60 }
  0x60   : > { %370 = vmatmul.f32.vlgmr.msra.gmra.mxu2 %v257_v32 }
  0xcf   : > { %v331_v50 = vpop.f32.mrf.mxu0  ;;  %v351_v51 = vpop.f32.mrf.mxu1 }
  0xd0   : > { %v332_v54 = vadd.f32 %v331_v50, %v308_v47  ;;  %v352_v55 = vadd.f32 %v351_v51, %v309_v48 }
  0xd2   : > { %v374_v57 = vmul.f32 %v352_v55, %v332_v54 }
  0xd4   : > { %v375_v58 = vmul.f32 0.17677669, %v374_v57 }
  0xd6   : > { %v379_v59 = vsel %vm378_vm0, %v375_v58, -inf }
  0xd7   : > { %380 = vmax.xlane.f32.xlu0 %v379_v59 }
  0xe3   : > { %v371_v3 = vpop.f32.mrf.mxu2 }
  0xe4   : > { %v372_v4 = vadd.f32 %v371_v3, %v310_v2 }
 0x14a   : > { %v381_v61 = vpop.xlane.xlu0 %380 }
 0x14b   : > { %v382_v62 = vsub.f32 %v379_v59, %v381_v61 }
 0x14d   : > { %v383_v63 = vmul.f32 1.442695, %v382_v62 }
 0x14f   : > { %642 = vpow2.f32 %v383_v63 }
 0x155   : > { %v643_v0 = vpop.eup %642 }
 0x156   : > { %385 = vadd.xlane.f32.xlu0 %v643_v0 }
 0x1c9   : > { %v386_v1 = vpop.xlane.xlu0 %385 }
 0x1ca   : > { %644 = vrcp.f32 %v386_v1 }
 0x1d0   : > { %v645_v5 = vpop.eup %644 }
 0x1d1   : > { %v388_v6 = vmul.f32 %v645_v5, %v643_v0 }
 0x1d3   : > { %v389_v7 = vmul.f32 %v388_v6, %v372_v4  ;;  %391 = vst [vmem:[%s256_s9] sm:$0xff] %v388_v6 }
 0x1d4   : > { %763 = shalt.err (!%p760_p9)
}
 0x1d5   : > { %579 = dma.vmem_to_hbm [thread:$0]  (%p938_p4), %s425_s10, 128, %s427_s21, %s398_s12   ;;  %390 = vst [vmem:[%s249_s22] sm:$0xff] %v389_v7 }
 0x1d6   : > { %s393_s5 = scalar_lea.sflag [#allocation4], %s969_s14  ;;  %s778_s6 = sshra.s32 %s1001_s25, 4  ;;  %s779_s6 = int_to_ptr.hbm [resolvable:$true] %s778_s6 }
 0x1d7   : > { %s780_s7 = scalar_lea.hbm %s779_s6, 8  ;;  %s784_s28 = scalar_lea.hbm %s1050_s3, 16 }
 0x1d8   : > { %p781_p10 = scmp.ne.s32.totalorder %s779_s6, %s780_s7  ;;  %p785_p0 = scmp.lt.s32.totalorder %s779_s6, %s1050_s3 }
 0x1d9   : > { %p786_p2 = scmp.lt.s32.totalorder %s784_s28, %s780_s7 }
 0x1da   : > { %p782_p13 = pnand %p781_p10, %p938_p4 }
 0x1db   : > { %p787_p1 = por %p786_p2, %p785_p0 }
 0x1dc   : > { %p783_p11 = pneg %p782_p13 }
 0x1de   : > { %p788_p3 = pnand %p787_p1, %p783_p11 }
 0x1e0   : > { %791 = shalt.err (!%p788_p3)
}
 0x1e1   : > { %578 = dma.vmem_to_hbm [thread:$0]  (%p938_p4), %s411_s24, 128, %s1001_s25, %s393_s5  }
 0x1e2 PF: > { %s438_s14 = sand.u32 1, %s826_s15   ;;  %p1058_p5 = scmp.ge.s32.totalorder %s838_s18, 2 }
 0x1e3   : > { %s439_s10 = scalar_lea.sflag [#allocation4], %s438_s14 }
 0x1e4   : > { %p594_p12 = pnand %p1058_p5, %p942_p6 }
 0x1e6   : > { %p595_p7 = pneg %p594_p12 }
 0x1e8   : > { %817 = dma.done.wait (%p595_p7), %s439_s10, 128  }
 0x1e9   : > { %819 = vsyncadd (%p595_p7), %s439_s10, 4294967168  ;;  %s449_s21 = scalar_lea.sflag [#allocation10], %s438_s14 }
 0x1ea   : > { %821 = dma.done.wait (%p595_p7), %s449_s21, 128  }
 0x1eb   : > { %823 = vsyncadd (%p595_p7), %s449_s21, 4294967168  ;;  %p22_p4 = scmp.ge.s32.totalorder %s912_s8, 4   ;;  %s1059_s15 = smov %s830_s16 }
 0x1ec   : > { %s1060_s16 = smov %s834_s17  ;;  %s1061_s17 = smov %s923_s11 }
 0x1ed   : > { %s1062_s18 = smov %s912_s8  ;;  %24 = sbr.rel (!%p22_p4) target bundleno = 8 (0x8), region = 102 }
 0x1f2   :  { %455 = vsyncpa [#allocation3], 1 }
 0x1f3   :  { %457 = vsyncpa [#allocation3 + $0x1], 1 }
 0x1f4   :  { %458 = vsyncpa [#allocation6], 1 }
 0x1f5   :  { %459 = vsyncpa [#allocation4], 1 }
 0x1f6   :  { %461 = vsyncpa [#allocation4 + $0x1], 1 }
 0x1f7   :  { %462 = vsyncpa [#allocation10], 1 }
 0x1f8   :  { %464 = vsyncpa [#allocation10 + $0x1], 1 }

</bundles_post_ra>
